<compile_context>
chip_gen: v6e
topology: v6e:2x2x1
jax: 0.10.0
libtpu: 0.0.40
codegen_flags: <defaults>
</compile_context>

<pallas_src>
import jax
import jax.numpy as jnp
from jax.experimental import pallas as pl
from jax.experimental.pallas import tpu as pltpu


D_IN = 32          # readout MLP input width
H1 = 16            # hidden width of first Linear
H2 = 1             # output width of second Linear
SLAB_W = 128       # lane-dense packed output width (one full vreg lane group)
PAD_W = SLAB_W - (D_IN + 1 + H1 + 1 + H2 + H1 + H2)   # = 60
TB_MAX = 4096      # max batch tile (double-buffered VMEM ~5 MiB: safe on v7x too)

# packed-slab column layout
_F1_LO, _F1_HI = 0, D_IN + 1                 # feat1  [x | 1]          : 0..33
_F2_LO, _F2_HI = _F1_HI, _F1_HI + H1 + 1     # feat2  [silu(h1) | 1]   : 33..50
_Y_LO, _Y_HI = _F2_HI, _F2_HI + H2           # y                       : 50..51
_G1_LO, _G1_HI = _Y_HI, _Y_HI + H1           # grad1                   : 51..67
_G2_LO, _G2_HI = _G1_HI, _G1_HI + H2         # grad2 (== 1)            : 67..68


def _readout_feature_kernel(x_ref, w1_ref, b1_ref, w2r_ref, b2_ref, out_ref):
    """Fused readout-MLP forward + hook captures + analytic backward.

    Inputs (per batch tile):
      x_ref   : (TB, D_IN)
      w1_ref  : (D_IN, H1), b1_ref : (1, H1)
      w2r_ref : (1, H1)   -- w2 transposed (its single column, lane-major)
      b2_ref  : (1, 1)
    Output:
      out_ref : (TB, 128) lane-dense slab:
                [ x | 1 | silu(h1) | 1 | y | grad1 | grad2(=1) | zero-pad ]
    """
    x = x_ref[...]
    tb = x.shape[0]
    ones1 = jnp.ones((tb, 1), jnp.float32)
    padz = jnp.zeros((tb, PAD_W), jnp.float32)

    # ---- Linear1 + SiLU (MXU matmul, f32 accumulate) ------------------------
    h1 = jnp.dot(x, w1_ref[...], preferred_element_type=jnp.float32) + b1_ref[...]
    sig = jax.nn.sigmoid(h1)
    a1 = h1 * sig  # SiLU

    # ---- Linear2: N=1 output -> VPU multiply + lane reduction (no MXU) ------
    w2_row = w2r_ref[...]                                   # (1, H1)
    y = jnp.sum(a1 * w2_row, axis=-1, keepdims=True) + b2_ref[...]

    # ---- backward under L = sum(y) ------------------------------------------
    # grad_output of Linear2 is all-ones; grad_output of Linear1 is
    #   (ones @ w2.T) * SiLU'(h1) = broadcast(w2 column) * SiLU'(h1)
    # SiLU'(h) = sigmoid(h) * (1 + h * (1 - sigmoid(h)))
    grad1 = w2_row * (sig * (1.0 + h1 * (1.0 - sig)))       # (1,H1)*(TB,H1)

    # ---- single lane-dense store of everything -------------------------------
    out_ref[...] = jnp.concatenate(
        [x, ones1,            # feat1 = pre-hook capture of Linear1 input
         a1, ones1,           # feat2 = pre-hook capture of Linear2 input
         y,                   # model output
         grad1,               # grad_output of Linear1
         ones1,               # grad_output of Linear2 (== 1)
         padz],
        axis=-1)


def _round_up(n, m):
    return ((n + m - 1) // m) * m


def readout_feature_extract(x, w1, b1, w2, b2):
    """Run the fused Pallas kernel over the batch; returns the 5 hook tensors."""
    B = x.shape[0]
    tb = max(8, min(TB_MAX, _round_up(B, 8)))
    Bp = _round_up(B, tb)
    if Bp != B:
        x = jnp.pad(x, ((0, Bp - B), (0, 0)))
    grid = (Bp // tb,)

    w2_row = w2.reshape(1, H1 * H2)[:, :H1] if w2.shape == (H1, H2) else w2
    w2_row = jnp.transpose(w2).reshape(1, H1)   # (1, H1): w2's single column as a row
    b2_s = b2.reshape(1, 1)

    full = lambda r, c: pl.BlockSpec((r, c), lambda i: (0, 0))
    batched = lambda c: pl.BlockSpec((tb, c), lambda i: (i, 0))

    cost = pl.CostEstimate(
        flops=2 * Bp * D_IN * H1 + 8 * Bp * H1,
        transcendentals=Bp * H1,
        bytes_accessed=4 * (Bp * D_IN + Bp * SLAB_W + D_IN * H1 + 2 * H1 + 1),
    )

    slab = pl.pallas_call(
        _readout_feature_kernel,
        out_shape=jax.ShapeDtypeStruct((Bp, SLAB_W), jnp.float32),
        grid_spec=pltpu.PrefetchScalarGridSpec(
            num_scalar_prefetch=0,
            grid=grid,
            in_specs=[
                batched(D_IN),        # x (tiled over batch)
                full(D_IN, H1),       # w1 (resident)
                full(1, H1),          # b1 (resident)
                full(1, H1),          # w2 row (resident)
                full(1, 1),           # b2 (resident)
            ],
            out_specs=batched(SLAB_W),
        ),
        compiler_params=pltpu.CompilerParams(
            dimension_semantics=("parallel",)),
        cost_estimate=cost,
    )(x, w1, b1, w2_row, b2_s)

    # wrapper-side slicing back into the five hook tensors (layout plumbing)
    slab = slab[:B]
    feat1 = slab[:, _F1_LO:_F1_HI]
    feat2 = slab[:, _F2_LO:_F2_HI]
    y = slab[:, _Y_LO:_Y_HI]
    grad1 = slab[:, _G1_LO:_G1_HI]
    grad2 = slab[:, _G2_LO:_G2_HI]
    return feat1, feat2, y, grad1, grad2


class FeatureExtractor:
    """JAX/Pallas analogue of curator.layer.FeatureExtractor.

    The hooked readout MLP (Linear -> SiLU -> Linear) is synthesized here with
    deterministic parameters; the hook captures are produced by the Pallas
    kernel above.
    """

    def __init__(self, params, model_outputs=("feature", "gradient"),
                 target_layer="readout_mlp"):
        self.params = params
        self.model_outputs = list(model_outputs)
        self.target_layer = target_layer
        self._features = []
        self._grads = []

    def _run_repr_callback(self, x):
        w1, b1, w2, b2 = self.params
        feat1, feat2, y, grad1, grad2 = readout_feature_extract(x, w1, b1, w2, b2)
        # forward-pre-hooks fire in layer order:
        self._features = [feat1, feat2]
        # backward hooks fire in reverse layer order (layer2 first):
        self._grads = [grad2, grad1]
        return y

    def forward(self, data, predict=False):
        if predict:
            data["output"] = self._run_repr_callback(data["x"])
        data["feature"] = self._features
        data["gradient"] = self._grads[::-1]
        self._features = []
        self._grads = []
        return data

    __call__ = forward

    def __repr__(self):
        return f"{self.__class__.__name__}(target_layer={self.target_layer})"


def _reference(x, w1, b1, w2, b2):
    """Plain-JAX reference for correctness check."""
    feat1 = jnp.concatenate([x, jnp.ones_like(x[:, 0:1])], axis=-1)
    h1 = x @ w1 + b1
    sig = jax.nn.sigmoid(h1)
    a1 = h1 * sig
    feat2 = jnp.concatenate([a1, jnp.ones_like(a1[:, 0:1])], axis=-1)
    y = a1 @ w2 + b2
    g2 = jnp.ones_like(y)
    grad1 = (g2 @ w2.T) * (sig * (1.0 + h1 * (1.0 - sig)))
    return feat1, feat2, y, grad1, g2


if __name__ == "__main__":
    key = jax.random.PRNGKey(0)
    k_x, k_w1, k_b1, k_w2, k_b2 = jax.random.split(key, 5)

    B = 8
    x = jax.random.normal(k_x, (B, D_IN), dtype=jnp.float32)
    w1 = jax.random.normal(k_w1, (D_IN, H1), dtype=jnp.float32) * 0.1
    b1 = jax.random.normal(k_b1, (1, H1), dtype=jnp.float32) * 0.1
    w2 = jax.random.normal(k_w2, (H1, H2), dtype=jnp.float32) * 0.1
    b2 = jax.random.normal(k_b2, (1, H2), dtype=jnp.float32) * 0.1

    extractor = FeatureExtractor(params=(w1, b1, w2, b2))
    data = {"x": x}
    data = extractor(data, predict=True)

    # block on everything
    jax.block_until_ready(data["output"])
    for t in data["feature"] + data["gradient"]:
        jax.block_until_ready(t)

    # correctness check vs plain-JAX reference
    ref_feat1, ref_feat2, ref_y, ref_grad1, ref_grad2 = _reference(x, w1, b1, w2, b2)
    assert jnp.allclose(data["feature"][0], ref_feat1, atol=1e-5)
    assert jnp.allclose(data["feature"][1], ref_feat2, atol=1e-5)
    assert jnp.allclose(data["output"], ref_y, atol=1e-5)
    # forward() returns grads reversed -> [grad_layer1_out, grad_layer2_out]
    assert jnp.allclose(data["gradient"][0], ref_grad1, atol=1e-5)
    assert jnp.allclose(data["gradient"][1], ref_grad2, atol=1e-5)

    # also exercise a non-tile-multiple batch (cdiv + padding path)
    xb = jax.random.normal(k_x, (13, D_IN), dtype=jnp.float32)
    f1b, f2b, yb, g1b, g2b = readout_feature_extract(xb, w1, b1, w2, b2)
    jax.block_until_ready(yb)
    rf1, rf2, ry, rg1, rg2 = _reference(xb, w1, b1, w2, b2)
    assert jnp.allclose(f1b, rf1, atol=1e-5)
    assert jnp.allclose(f2b, rf2, atol=1e-5)
    assert jnp.allclose(yb, ry, atol=1e-5)
    assert jnp.allclose(g1b, rg1, atol=1e-5)
    assert jnp.allclose(g2b, rg2, atol=1e-5)

    # TODO(synk): hook registration on an arbitrary external repr_callback
    # (find_layer_by_name_recursive / MACE special-casing) has no Pallas
    # equivalent; the synthetic readout MLP above stands in for it.
    print("KERNEL_OK")
</pallas_src>

<mosaic_0001>
module attributes {stable_mosaic.version = 11 : i64} {
  func.func @_readout_feature_kernel(%arg0: i32, %arg1: memref<8x32xf32, #tpu.memory_space<vmem>>, %arg2: memref<32x16xf32, #tpu.memory_space<vmem>>, %arg3: memref<1x16xf32, #tpu.memory_space<vmem>>, %arg4: memref<1x16xf32, #tpu.memory_space<vmem>>, %arg5: memref<1x1xf32, #tpu.memory_space<vmem>>, %arg6: memref<8x128xf32, #tpu.memory_space<vmem>>) attributes {dimension_semantics = [#tpu.dimension_semantics<parallel>], iteration_bounds = array<i64: 1>, scalar_prefetch = 0 : i64, scratch_operands = 0 : i64, tpu.core_type = #tpu.core_type<tc>, window_params = [{transform_indices = @transform_0, window_bounds = array<i64: 8, 32>}, {pipeline_mode = #tpu.pipeline_mode<synchronous>, transform_indices = @transform_1, window_bounds = array<i64: 32, 16>}, {pipeline_mode = #tpu.pipeline_mode<synchronous>, transform_indices = @transform_2, window_bounds = array<i64: 1, 16>}, {pipeline_mode = #tpu.pipeline_mode<synchronous>, transform_indices = @transform_3, window_bounds = array<i64: 1, 16>}, {pipeline_mode = #tpu.pipeline_mode<synchronous>, transform_indices = @transform_4, window_bounds = array<i64: 1, 1>}, {transform_indices = @transform_5, window_bounds = array<i64: 8, 128>}]} {
    %c0 = arith.constant 0 : index
    %c0_0 = arith.constant 0 : index
    %0 = vector.load %arg1[%c0, %c0_0] : memref<8x32xf32, #tpu.memory_space<vmem>>, vector<8x32xf32>
    %cst = arith.constant 1.000000e+00 : f32
    %1 = vector.broadcast %cst : f32 to vector<8x1xf32>
    %cst_1 = arith.constant 0.000000e+00 : f32
    %2 = vector.broadcast %cst_1 : f32 to vector<8x60xf32>
    %c0_2 = arith.constant 0 : index
    %c0_3 = arith.constant 0 : index
    %3 = vector.load %arg2[%c0_2, %c0_3] : memref<32x16xf32, #tpu.memory_space<vmem>>, vector<32x16xf32>
    %cst_4 = arith.constant dense<0.000000e+00> : vector<8x16xf32>
    %4 = tpu.matmul %0, %3, %cst_4 {dimension_numbers = #tpu.dot_dimension_numbers<[1], [0], [0], [1], [0, 0, 1, 1], [], []>} : vector<8x32xf32>, vector<32x16xf32>, vector<8x16xf32> -> vector<8x16xf32>
    %c0_5 = arith.constant 0 : index
    %c0_6 = arith.constant 0 : index
    %5 = vector.load %arg3[%c0_5, %c0_6] : memref<1x16xf32, #tpu.memory_space<vmem>>, vector<1x16xf32>
    %6 = vector.broadcast %5 : vector<1x16xf32> to vector<8x16xf32>
    %7 = arith.addf %4, %6 : vector<8x16xf32>
    %8 = arith.negf %7 : vector<8x16xf32>
    %9 = math.exp %8 : vector<8x16xf32>
    %cst_7 = arith.constant 1.000000e+00 : f32
    %10 = vector.broadcast %cst_7 : f32 to vector<8x16xf32>
    %11 = arith.addf %10, %9 : vector<8x16xf32>
    %12 = arith.divf %10, %11 : vector<8x16xf32>
    %13 = arith.mulf %7, %12 : vector<8x16xf32>
    %c0_8 = arith.constant 0 : index
    %c0_9 = arith.constant 0 : index
    %14 = vector.load %arg4[%c0_8, %c0_9] : memref<1x16xf32, #tpu.memory_space<vmem>>, vector<1x16xf32>
    %15 = vector.broadcast %14 : vector<1x16xf32> to vector<8x16xf32>
    %16 = arith.mulf %13, %15 : vector<8x16xf32>
    %cst_10 = arith.constant dense<0.000000e+00> : vector<8xf32>
    %17 = vector.multi_reduction <add>, %16, %cst_10 [1] : vector<8x16xf32> to vector<8xf32>
    %18 = vector.shape_cast %17 : vector<8xf32> to vector<8x1xf32>
    %c0_11 = arith.constant 0 : index
    %c0_12 = arith.constant 0 : index
    %19 = vector.load %arg5[%c0_11, %c0_12] : memref<1x1xf32, #tpu.memory_space<vmem>>, vector<1x1xf32>
    %20 = vector.broadcast %19 : vector<1x1xf32> to vector<8x1xf32>
    %21 = arith.addf %18, %20 : vector<8x1xf32>
    %cst_13 = arith.constant 1.000000e+00 : f32
    %22 = vector.broadcast %cst_13 : f32 to vector<8x16xf32>
    %23 = arith.subf %22, %12 : vector<8x16xf32>
    %24 = arith.mulf %7, %23 : vector<8x16xf32>
    %cst_14 = arith.constant 1.000000e+00 : f32
    %25 = vector.broadcast %cst_14 : f32 to vector<8x16xf32>
    %26 = arith.addf %25, %24 : vector<8x16xf32>
    %27 = arith.mulf %12, %26 : vector<8x16xf32>
    %28 = vector.broadcast %14 : vector<1x16xf32> to vector<8x16xf32>
    %29 = arith.mulf %28, %27 : vector<8x16xf32>
    %30 = tpu.concatenate %0, %1, %13, %1, %21, %29, %1, %2 in 1 : vector<8x32xf32>, vector<8x1xf32>, vector<8x16xf32>, vector<8x1xf32>, vector<8x1xf32>, vector<8x16xf32>, vector<8x1xf32>, vector<8x60xf32> -> vector<8x128xf32>
    %c0_15 = arith.constant 0 : index
    %c0_16 = arith.constant 0 : index
    %31 = vector.load %arg6[%c0_15, %c0_16] : memref<8x128xf32, #tpu.memory_space<vmem>>, vector<8x128xf32>
    tpu.vector_store %arg6[%c0_15, %c0_16], %30 {strides = array<i32>} : memref<8x128xf32, #tpu.memory_space<vmem>>, vector<8x128xf32>,
    return
  }
  func.func @transform_0(%arg0: i32) -> (i32, i32) {
    %c0_i32 = arith.constant 0 : i32
    %c0_i32_0 = arith.constant 0 : i32
    return %arg0, %c0_i32 : i32, i32
  }
  func.func @transform_1(%arg0: i32) -> (i32, i32) {
    %c0_i32 = arith.constant 0 : i32
    %c0_i32_0 = arith.constant 0 : i32
    %c0_i32_1 = arith.constant 0 : i32
    return %c0_i32, %c0_i32_0 : i32, i32
  }
  func.func @transform_2(%arg0: i32) -> (i32, i32) {
    %c0_i32 = arith.constant 0 : i32
    %c0_i32_0 = arith.constant 0 : i32
    %c0_i32_1 = arith.constant 0 : i32
    return %c0_i32, %c0_i32_0 : i32, i32
  }
  func.func @transform_3(%arg0: i32) -> (i32, i32) {
    %c0_i32 = arith.constant 0 : i32
    %c0_i32_0 = arith.constant 0 : i32
    %c0_i32_1 = arith.constant 0 : i32
    return %c0_i32, %c0_i32_0 : i32, i32
  }
  func.func @transform_4(%arg0: i32) -> (i32, i32) {
    %c0_i32 = arith.constant 0 : i32
    %c0_i32_0 = arith.constant 0 : i32
    %c0_i32_1 = arith.constant 0 : i32
    return %c0_i32, %c0_i32_0 : i32, i32
  }
  func.func @transform_5(%arg0: i32) -> (i32, i32) {
    %c0_i32 = arith.constant 0 : i32
    %c0_i32_0 = arith.constant 0 : i32
    return %arg0, %c0_i32 : i32, i32
  }
}

</mosaic_0001>

<bundles_post_ra>
// kernel: tpu_custom_call.1
= control target key start
LH: loop header
LB: loop body
LE: loop exit
PB: predicated region body
PF: predicated region fallthrough
CT: control target
= control target key end

     0   :  { %s299_s0 = inlined_call_operand.vmem [shape: f32[8,32], index: 0, kind: input, shape index: {}]   ;;  %s300_s1 = inlined_call_operand.vmem [shape: f32[32,16], index: 1, kind: input, shape index: {}]   ;;  %s301_s2 = inlined_call_operand.vmem [shape: f32[1,16], index: 2, kind: input, shape index: {}]   ;;  %s302_s3 = inlined_call_operand.vmem [shape: f32[1,16], index: 3, kind: input, shape index: {}]   ;;  %s303_s4 = inlined_call_operand.<no memory space> [shape: f32[1,1], index: 4, kind: input, shape index: {}]   ;;  %s304_s5 = inlined_call_operand.hbm [shape: f32[8,128], index: 5, kind: output, shape index: {}]  }
   0x1   :  { %v10_v0 = vstv %s303_s4 }
   0x2   :  { %11 = vst [vmem:[#allocation2] sm:$0x1] %v10_v0 }
   0x3   :  { %v27_v1 = vld [vmem:[%s300_s1 + $0x18] sm:$0xff]  ;;  %v234_v2 = vmov 0.0   ;;  %v26_v3 = vld [vmem:[%s300_s1 + $0x10] sm:$0xff]  ;;  %vm235_vm0 = vmmov 0  }
   0x4   :  { %191 = vmatprep.subr.mxu0 %v234_v2  ;;  %199 = vmatprep.mubr.msk.f32.mxu0 %vm235_vm0, %v234_v2 }
   0x5   :  { %192 = vmatpush3.msra.mxu0 %v27_v1 }
   0x6   :  { %12 = vsyncpa [#allocation4], 0  ;;  %193 = vmatprep.subr.mxu0 %v234_v2  ;;  %v25_v4 = vld [vmem:[%s300_s1 + $0x8] sm:$0xff]  ;;  %v24_v5 = vld [vmem:[%s300_s1] sm:$0xff]  ;;  %vm35_vm1 = vcmask 261120   ;;  %vm124_vm2 = vcmask 130048  }
   0x7   :  { %194 = vmatpush3.msra.mxu0 %v26_v3  ;;  %v23_v6 = vld [vmem:[%s299_s0] sm:$0xff]  ;;  %s237_s6 = smov 50   ;;  %s238_s7 = smov 51   ;;  %vm154_vm3 = vcmask 269312   ;;  %vm156_vm4 = vcmask 400384   ;;  %vm158_vm5 = vcmask 408576  }
   0x8   :  { %195 = vmatprep.subr.mxu0 %v234_v2  ;;  %v181_v7 = vld [vmem:[%s301_s2] ss:$0 sm:$0xff]  ;;  %s236_s2 = smov 33   ;;  %v153_v27 = vsel %vm35_vm1, %v23_v6, 1.0  ;;  %vm160_vm6 = vcmask 416768   ;;  %vm162_vm7 = vcmask 547840  }
   0x9   :  { %196 = vmatpush3.msra.mxu0 %v25_v4  ;;  %v184_v15 = vld [vmem:[%s302_s3] ss:$0 sm:$0xff]  ;;  %s239_s3 = smov [#allocation3]   ;;  %vm164_vm8 = vcmask 556032  }
   0xa   :  { %197 = vmatprep.subr.mxu0 %v234_v2  ;;  %v185_v24 = vld [vmem:[#allocation2] ss:$0 sm:$0xff]  ;;  %s173_s8 = sshll.u32 %s239_s3, 4  ;;  %s174_s8 = int_to_ptr.vmem [resolvable:$true] %s173_s8 }
   0xb   :  { %198 = vmatpush3.msra.mxu0 %v24_v5  ;;  %s212_s9 = scalar_lea.vmem %s174_s8, 128  ;;  %p217_p1 = scmp.lt.s32.totalorder %s174_s8, %s174_s8 }
   0xc   :  { %200 = vmatmul.mubr.msk.f32.vlgmr.msra.gmra.mxu0 %vm35_vm1, %v23_v6  ;;  %p213_p0 = scmp.ne.s32.totalorder %s174_s8, %s212_s9  ;;  %p218_p2 = scmp.lt.s32.totalorder %s212_s9, %s212_s9 }
   0xe   :  { %p219_p3 = por %p218_p2, %p217_p1 }
  0x10   :  { %p220_p4 = pnand %p219_p3, %p213_p0 }
  0xcc   :  { %v105_v8 = vpop.f32.mrf.mxu0 }
  0xcd   :  { %v106_v9 = vadd.f32 %v181_v7, %v105_v8 }
  0xce   :  { %v201_v10 = vpop.f32.mrf.mxu0 }
  0xcf   :  { %v183_v11 = vmul.f32 -1.442695, %v106_v9 }
  0xd1   :  { %208 = vpow2.f32 %v183_v11 }
  0xde   :  { %v209_v12 = vpop.eup %208 }
  0xdf   :  { %v112_v13 = vadd.f32 1.0, %v209_v12 }
  0xe1   :  { %210 = vrcp.f32 %v112_v13 }
  0xee   :  { %v211_v14 = vpop.eup %210 }
  0xef   :  { %v136_v16 = vsub.f32 1.0, %v211_v14  ;;  %v115_v17 = vmul.f32 %v211_v14, %v106_v9 }
  0xf1   :  { %v137_v18 = vmul.f32 %v136_v16, %v106_v9  ;;  %v123_v19 = vmul.f32 %v184_v15, %v115_v17 }
  0xf3   :  { %v138_v20 = vadd.f32 1.0, %v137_v18  ;;  %v125_v21 = vsel %vm124_vm2, %v123_v19, 0.0 }
  0xf4   :  { %126 = vadd.xlane.f32.xlu0 %v125_v21 }
  0xf5   :  { %v139_v22 = vmul.f32 %v211_v14, %v138_v20 }
  0xf7   :  { %v140_v23 = vmul.f32 %v184_v15, %v139_v22 }
 0x10a   :  { %142 = vrot.lane.b32.xlu0 %v115_v17, %s236_s2 }
 0x17d   :  { %v127_v25 = vpop.xlane.xlu0 %126 }
 0x17e   :  { %v135_v26 = vadd.f32 %v185_v24, %v127_v25 }
 0x180   :  { %146 = vrot.lane.b32.xlu1 %v135_v26, %s237_s6 }
 0x181   :  { %v143_v28 = vpop.permute.xlu0 %142 }
 0x182   :  { %v155_v29 = vsel %vm154_vm3, %v153_v27, %v143_v28 }
 0x183   :  { %v157_v31 = vsel %vm156_vm4, %v155_v29, 1.0 }
 0x184   :  { %150 = vrot.lane.b32.xlu1 %v140_v23, %s238_s7 }
 0x1f2   :  { %v147_v30 = vpop.permute.xlu1 %146 }
 0x1f3   :  { %v159_v32 = vsel %vm158_vm5, %v157_v31, %v147_v30 }
 0x1f6   :  { %v151_v33 = vpop.permute.xlu1 %150 }
 0x1f7   :  { %v161_v34 = vsel %vm160_vm6, %v159_v32, %v151_v33 }
 0x1f8   :  { %v163_v35 = vsel %vm162_vm7, %v161_v34, 1.0 }
 0x1f9   :  { %v165_v36 = vsel %vm164_vm8, %v163_v35, 0.0 }
 0x1fa   :  { %166 = vst [vmem:[#allocation3] sm:$0xff] %v165_v36 }
 0x1fb   :  { %223 = shalt.err (!%p220_p4)
}
 0x1fc   :  { %176 = dma.vmem_to_hbm [thread:$0]  %s174_s8, 128, %s304_s5, [#allocation4]  }
 0x1fd   :  { %232 = dma.done.wait [#allocation4], 128  }
 0x1fe   :  { %233 = vsyncadd [#allocation4], 4294967168 }
 0x1ff   :  { %180 = vsyncpa [#allocation4], 1 }

</bundles_post_ra>
